<compile_context>
chip_gen: v5e
topology: v5e:2x2
jax: 0.10.0
libtpu: 0.0.40
codegen_flags: <defaults>
</compile_context>

<pallas_src>
import jax
import jax.numpy as jnp
from jax.experimental import pallas as pl
from jax.experimental.pallas import tpu as pltpu

LANES = 128
SUBLANES = 8
MAX_ROW_TILE = 1024  # 1024 x 128 x 4 B = 512 KiB per input block


def _mse_partial_kernel(a_ref, b_ref, acc_ref):
    """Accumulate elementwise squared differences into a resident f32 slab.

    grid = (n_par, inner).  The output block index depends only on the leading
    (parallel) axis, so the accumulator stays resident in VMEM across the
    inner reduction axis and is written back to HBM once per chunk.
    """
    k = pl.program_id(1)

    @pl.when(k == 0)
    def _():
        acc_ref[...] = jnp.zeros_like(acc_ref)

    # astype is a no-op for f32 inputs; for bf16 it widens in-vreg so the
    # accumulation happens in f32 while HBM traffic stays at bf16 width.
    d = a_ref[...].astype(jnp.float32) - b_ref[...].astype(jnp.float32)
    acc_ref[...] += d * d


def _sum_sq_diff_bulk(a2d, b2d, row_tile, n_par, inner):
    """Sum of squared differences over a (num_blocks*row_tile, 128) slab."""
    num_blocks = n_par * inner
    itemsize = jnp.dtype(a2d.dtype).itemsize
    n_bulk = num_blocks * row_tile * LANES
    cost = pl.CostEstimate(
        flops=3 * n_bulk,  # sub, mul, add per element
        transcendentals=0,
        bytes_accessed=2 * n_bulk * itemsize + n_par * row_tile * LANES * 4,
    )

    acc = pl.pallas_call(
        _mse_partial_kernel,
        out_shape=jax.ShapeDtypeStruct((n_par * row_tile, LANES), jnp.float32),
        grid_spec=pltpu.PrefetchScalarGridSpec(
            num_scalar_prefetch=0,
            grid=(n_par, inner),
            in_specs=[
                pl.BlockSpec((row_tile, LANES), lambda p, k: (p * inner + k, 0)),
                pl.BlockSpec((row_tile, LANES), lambda p, k: (p * inner + k, 0)),
            ],
            out_specs=pl.BlockSpec((row_tile, LANES), lambda p, k: (p, 0)),
        ),
        compiler_params=pltpu.CompilerParams(
            dimension_semantics=("parallel", "arbitrary"),
        ),
        cost_estimate=cost,
    )(a2d, b2d)
    return jnp.sum(acc, dtype=jnp.float32)


@jax.jit
def mse_loss_pallas(ori, recon):
    assert ori.shape == recon.shape, "ori / recon must have identical shapes"
    n = ori.size

    a = jnp.ravel(ori)
    b = jnp.ravel(recon)

    rows_total = n // LANES
    # Largest sublane-aligned row tile (<= MAX_ROW_TILE) that fits the input.
    row_tile = min(MAX_ROW_TILE, (rows_total // SUBLANES) * SUBLANES)

    if row_tile < SUBLANES:
        # Too small for even one (8, 128) tile; plain JAX is optimal here.
        d = a.astype(jnp.float32) - b.astype(jnp.float32)
        return (jnp.sum(d * d) / jnp.float32(n)).astype(jnp.float32)

    block_elems = row_tile * LANES
    num_blocks = n // block_elems
    # Keep an even block count when possible so the leading 'parallel' grid
    # axis can shard evenly across the two TensorCores of a v7x chip (the odd
    # leftover block is folded into the tiny plain-JAX tail).
    if num_blocks >= 2 and num_blocks % 2 == 1:
        num_blocks -= 1
    n_par = 2 if num_blocks >= 2 else 1
    inner = num_blocks // n_par

    n_bulk = num_blocks * block_elems

    if n_bulk == n:  # common case: no slicing / padding / extra HBM traffic
        a_bulk, b_bulk = a, b
        tail_sum = jnp.float32(0.0)
    else:
        a_bulk, b_bulk = a[:n_bulk], b[:n_bulk]
        dt = a[n_bulk:].astype(jnp.float32) - b[n_bulk:].astype(jnp.float32)
        tail_sum = jnp.sum(dt * dt)

    a2d = a_bulk.reshape(num_blocks * row_tile, LANES)
    b2d = b_bulk.reshape(num_blocks * row_tile, LANES)

    bulk_sum = _sum_sq_diff_bulk(a2d, b2d, row_tile, n_par, inner)
    return ((bulk_sum + tail_sum) / jnp.float32(n)).astype(jnp.float32)


class ImageMSELoss:
    """Pallas port of the PyTorch ImageMSELoss module."""

    def __init__(self, weight):
        # Kept for parity with the PyTorch module; unused in forward.
        self.weight = weight

    def __call__(self, inputs):
        return mse_loss_pallas(inputs["ori"], inputs["recon"])


if __name__ == "__main__":
    key = jax.random.PRNGKey(0)
    k1, k2, k3, k4 = jax.random.split(key, 4)

    loss_mod = ImageMSELoss(weight=1.0)

    # NCHW, small shapes: batch=2, channels=4, spatial=16x16 (lane-aligned).
    ori = jax.random.normal(k1, (2, 4, 16, 16), dtype=jnp.float32)
    recon = jax.random.normal(k2, (2, 4, 16, 16), dtype=jnp.float32)
    out = loss_mod({"ori": ori, "recon": recon})
    out = jax.block_until_ready(out)
    ref = jnp.mean((ori - recon) ** 2)
    assert jnp.allclose(out, ref, rtol=1e-6, atol=1e-6), (out, ref)

    # Non-aligned shape: exercises the kernel-bulk + plain-JAX-tail path.
    ori2 = jax.random.normal(k3, (2, 3, 17, 19), dtype=jnp.float32)
    recon2 = jax.random.normal(k4, (2, 3, 17, 19), dtype=jnp.float32)
    out2 = loss_mod({"ori": ori2, "recon": recon2})
    out2 = jax.block_until_ready(out2)
    ref2 = jnp.mean((ori2 - recon2) ** 2)
    assert jnp.allclose(out2, ref2, rtol=1e-6, atol=1e-6), (out2, ref2)

    print("KERNEL_OK")
</pallas_src>

<mosaic_0001>
module attributes {stable_mosaic.version = 11 : i64} {
  func.func @_mse_partial_kernel(%arg0: i32, %arg1: i32, %arg2: memref<16x128xf32, #tpu.memory_space<vmem>>, %arg3: memref<16x128xf32, #tpu.memory_space<vmem>>, %arg4: memref<16x128xf32, #tpu.memory_space<vmem>>) attributes {dimension_semantics = [#tpu.dimension_semantics<parallel>, #tpu.dimension_semantics<arbitrary>], iteration_bounds = array<i64: 1, 1>, scalar_prefetch = 0 : i64, scratch_operands = 0 : i64, tpu.core_type = #tpu.core_type<tc>, window_params = [{transform_indices = @transform_0, window_bounds = array<i64: 16, 128>}, {transform_indices = @transform_1, window_bounds = array<i64: 16, 128>}, {transform_indices = @transform_2, window_bounds = array<i64: 16, 128>}]} {
    %c0_i32 = arith.constant 0 : i32
    %0 = arith.cmpi eq, %arg1, %c0_i32 : i32
    %1 = arith.extui %0 : i1 to i32
    %c0_i32_0 = arith.constant 0 : i32
    %2 = arith.cmpi ne, %1, %c0_i32_0 : i32
    scf.if %2 {
      %cst = arith.constant 0.000000e+00 : f32
      %10 = vector.broadcast %cst : f32 to vector<16x128xf32>
      %c0_8 = arith.constant 0 : index
      %c0_9 = arith.constant 0 : index
      %11 = vector.load %arg4[%c0_8, %c0_9] : memref<16x128xf32, #tpu.memory_space<vmem>>, vector<16x128xf32>
      tpu.vector_store %arg4[%c0_8, %c0_9], %10 {strides = array<i32>} : memref<16x128xf32, #tpu.memory_space<vmem>>, vector<16x128xf32>,
    } else {
    }
    %c0 = arith.constant 0 : index
    %c0_1 = arith.constant 0 : index
    %3 = vector.load %arg2[%c0, %c0_1] : memref<16x128xf32, #tpu.memory_space<vmem>>, vector<16x128xf32>
    %c0_2 = arith.constant 0 : index
    %c0_3 = arith.constant 0 : index
    %4 = vector.load %arg3[%c0_2, %c0_3] : memref<16x128xf32, #tpu.memory_space<vmem>>, vector<16x128xf32>
    %5 = arith.subf %3, %4 : vector<16x128xf32>
    %c0_4 = arith.constant 0 : index
    %c0_5 = arith.constant 0 : index
    %6 = vector.load %arg4[%c0_4, %c0_5] : memref<16x128xf32, #tpu.memory_space<vmem>>, vector<16x128xf32>
    %7 = arith.mulf %5, %5 : vector<16x128xf32>
    %8 = arith.addf %6, %7 : vector<16x128xf32>
    %c0_6 = arith.constant 0 : index
    %c0_7 = arith.constant 0 : index
    %9 = vector.load %arg4[%c0_6, %c0_7] : memref<16x128xf32, #tpu.memory_space<vmem>>, vector<16x128xf32>
    tpu.vector_store %arg4[%c0_6, %c0_7], %8 {strides = array<i32>} : memref<16x128xf32, #tpu.memory_space<vmem>>, vector<16x128xf32>,
    return
  }
  func.func @transform_0(%arg0: i32, %arg1: i32) -> (i32, i32) {
    %c1_i32 = arith.constant 1 : i32
    %0 = arith.muli %arg0, %c1_i32 : i32
    %1 = arith.addi %0, %arg1 : i32
    %c0_i32 = arith.constant 0 : i32
    %c0_i32_0 = arith.constant 0 : i32
    return %1, %c0_i32 : i32, i32
  }
  func.func @transform_1(%arg0: i32, %arg1: i32) -> (i32, i32) {
    %c1_i32 = arith.constant 1 : i32
    %0 = arith.muli %arg0, %c1_i32 : i32
    %1 = arith.addi %0, %arg1 : i32
    %c0_i32 = arith.constant 0 : i32
    %c0_i32_0 = arith.constant 0 : i32
    return %1, %c0_i32 : i32, i32
  }
  func.func @transform_2(%arg0: i32, %arg1: i32) -> (i32, i32) {
    %c0_i32 = arith.constant 0 : i32
    %c0_i32_0 = arith.constant 0 : i32
    return %arg0, %c0_i32 : i32, i32
  }
}

</mosaic_0001>

<bundles_post_ra>
// kernel: mse_loss_pallas.1
= control target key start
LH: loop header
LB: loop body
LE: loop exit
PB: predicated region body
PF: predicated region fallthrough
CT: control target
= control target key end

     0   :  { %s125_s0 = inlined_call_operand.vmem [shape: f32[16,128], index: 0, kind: input, shape index: {}]   ;;  %s126_s1 = inlined_call_operand.vmem [shape: f32[16,128], index: 1, kind: input, shape index: {}]   ;;  %s127_s2 = inlined_call_operand.vmem [shape: f32[16,128], index: 2, kind: output, shape index: {}]  }
   0x1   :  { %v61_v0 = vld [vmem:[%s125_s0] sm:$0xff]  ;;  %v62_v2 = vld [vmem:[%s125_s0 + $0x8] sm:$0xff] }
   0x2   :  { %v63_v1 = vld [vmem:[%s126_s1] sm:$0xff]  ;;  %v64_v4 = vld [vmem:[%s126_s1 + $0x8] sm:$0xff] }
   0x3   :  { %v65_v3 = vsub.f32 %v61_v0, %v63_v1  ;;  %v66_v5 = vsub.f32 %v62_v2, %v64_v4 }
   0x5   :  { %v69_v6 = vmul.f32 %v65_v3, %v65_v3  ;;  %v70_v7 = vmul.f32 %v66_v5, %v66_v5 }
   0x7   :  { %73 = vst [vmem:[%s127_s2] sm:$0xff] %v69_v6 }
   0x8   :  { %74 = vst [vmem:[%s127_s2 + $0x8] sm:$0xff] %v70_v7 }

</bundles_post_ra>
